<compile_context>
chip_gen: v7x
topology: tpu7x:2x2x1
jax: 0.10.0
libtpu: 0.0.40
codegen_flags: <defaults>
</compile_context>

<pallas_src>
import math

import jax
import jax.numpy as jnp
from jax.experimental import pallas as pl
from jax.experimental.pallas import tpu as pltpu

# ---------------- configuration (small, consistent with the module) ----------
B, CIN, H, W = 2, 4, 16, 16
COUT = 8
R = 4                      # kernel_rot (P4 group: 0/90/180/270 degrees)
KH = KW = 3
PAD = 1

K_IM2COL = KH * KW * CIN   # 36  (contraction dim of the lifting conv)
N_OUT = R * COUT           # 32  (rotation axis folded into channels)
BHW = B * H * W            # 512 (lane-dense pixel axis)


# ---------------- fused kernel: lifting conv + ReLU + group 1x1 + ReLU -------
def _fused_kernel(at_ref, wconv_t_ref, wcirc_t_ref, o_ref):
    # at_ref      : (K_IM2COL, BHW)   im2col patches, transposed (lane-dense)
    # wconv_t_ref : (R*COUT, K_IM2COL) rotation-folded 3x3 conv weight, transposed
    # wcirc_t_ref : (R*COUT, R*COUT)   block-circulant group-1x1 weight, transposed
    # o_ref       : (R*COUT, BHW)      rows = (rotation, cout), cols = (b, h, w)
    yT = jnp.dot(wconv_t_ref[...], at_ref[...],
                 preferred_element_type=jnp.float32)          # (32, 512)
    yT = jnp.maximum(yT, 0.0)                                 # _RConv activation
    oT = jnp.dot(wcirc_t_ref[...], yT,
                 preferred_element_type=jnp.float32)          # (32, 512)
    o_ref[...] = jnp.maximum(oT, 0.0).astype(o_ref.dtype)     # block activation


def _fused_call(at, wconv_t, wcirc_t):
    return pl.pallas_call(
        _fused_kernel,
        out_shape=jax.ShapeDtypeStruct((N_OUT, BHW), jnp.float32),
        grid=(1,),   # whole problem fits VMEM comfortably -> single grid point
        in_specs=[
            pl.BlockSpec((K_IM2COL, BHW), lambda i: (0, 0)),
            pl.BlockSpec((N_OUT, K_IM2COL), lambda i: (0, 0)),
            pl.BlockSpec((N_OUT, N_OUT), lambda i: (0, 0)),
        ],
        out_specs=pl.BlockSpec((N_OUT, BHW), lambda i: (0, 0)),
        compiler_params=pltpu.CompilerParams(
            dimension_semantics=("arbitrary",)),
    )(at, wconv_t, wcirc_t)


# ---------------- wrapper-side layout plumbing (plain JAX / XLA) --------------
def _im2col_T(x_nhwc):
    # [B, H, W, CIN] -> A^T : [KH*KW*CIN, B*H*W], k ordered (kh, kw, cin)
    xp = jnp.pad(x_nhwc, ((0, 0), (PAD, PAD), (PAD, PAD), (0, 0)))
    patches = [xp[:, kh:kh + H, kw:kw + W, :]
               for kh in range(KH) for kw in range(KW)]
    a = jnp.concatenate(patches, axis=-1)          # [B, H, W, 36]
    return a.reshape(BHW, K_IM2COL).T              # [36, 512]


def _fold_weights(w_base, wg):
    # Lifting-conv weight: fold all R spatial rotations into the N dim.
    #   Wconv^T : [R*COUT, 36], rows ordered (r, cout), cols ordered (kh,kw,cin)
    rows = []
    for r in range(R):
        w_r = jnp.transpose(jnp.rot90(w_base, k=r, axes=(2, 3)),
                            (2, 3, 1, 0))          # HWIO [KH,KW,CIN,COUT]
        rows.append(w_r.reshape(K_IM2COL, COUT).T)  # [COUT, 36]
    wconv_t = jnp.concatenate(rows, axis=0)        # [32, 36]

    # Group 1x1 as one block-circulant matrix:
    #   out[:, r-block] = sum_q y[:, q-block] @ wg[(q - r) % R]
    wcirc = jnp.block([[wg[(q - r) % R] for r in range(R)]
                       for q in range(R)])         # [32, 32]
    return wconv_t, wcirc.T


@jax.jit
def pr_conv_block(x_nchw, w_base, wg):
    # x_nchw: [B, Cin, H, W] (PyTorch layout)
    x = jnp.transpose(x_nchw, (0, 2, 3, 1))        # NHWC
    at = _im2col_T(x)                              # [36, 512]
    wconv_t, wcirc_t = _fold_weights(w_base, wg)   # [32,36], [32,32]
    out_t = _fused_call(at, wconv_t, wcirc_t)      # [32, 512]
    # rows (r, cout), cols (b, h, w)  ->  PyTorch-style [B, Cout, R, H, W]
    out = out_t.reshape(R, COUT, B, H, W)
    return jnp.transpose(out, (2, 1, 0, 3, 4))


# ---------------- pure-JAX reference (for a correctness check) ----------------
def ref_forward(x_nchw, w_base, wg):
    x = jnp.transpose(x_nchw, (0, 2, 3, 1))
    ys = []
    for r in range(R):
        w_r = jnp.transpose(jnp.rot90(w_base, k=r, axes=(2, 3)), (2, 3, 1, 0))
        y_r = jax.lax.conv_general_dilated(
            x, w_r, window_strides=(1, 1), padding=((PAD, PAD), (PAD, PAD)),
            dimension_numbers=("NHWC", "HWIO", "NHWC"))
        ys.append(jnp.maximum(y_r, 0.0))
    y = jnp.stack(ys, axis=1)                      # [B, R, H, W, Cout]
    outs = []
    for r in range(R):
        acc = sum(jnp.einsum("bhwc,cd->bhwd", y[:, (r + s) % R], wg[s])
                  for s in range(R))
        outs.append(jnp.maximum(acc, 0.0))
    out = jnp.stack(outs, axis=1)
    return jnp.transpose(out, (0, 4, 1, 2, 3))


# ---------------- main ---------------------------------------------------------
if __name__ == "__main__":
    key = jax.random.PRNGKey(0)
    kx, kw, kg = jax.random.split(key, 3)

    # deterministic synthetic parameters (kaiming_normal_, mode='fan_out', relu)
    fan_out_conv = COUT * KH * KW
    w_base = jax.random.normal(kw, (COUT, CIN, KH, KW), jnp.float32) \
        * math.sqrt(2.0 / fan_out_conv)
    # GConv1x1 weight (c2_msra_fill: kaiming fan_out + zero bias)
    wg = jax.random.normal(kg, (R, COUT, COUT), jnp.float32) \
        * math.sqrt(2.0 / (COUT * R))

    x = jax.random.normal(kx, (B, CIN, H, W), jnp.float32)

    out = jax.block_until_ready(pr_conv_block(x, w_base, wg))
    ref = jax.block_until_ready(ref_forward(x, w_base, wg))

    assert out.shape == (B, COUT, R, H, W), out.shape
    assert jnp.allclose(out, ref, rtol=1e-4, atol=1e-4), \
        float(jnp.max(jnp.abs(out - ref)))

    # TODO(synk): noise_var>0 (DefemLayer positional noise) and norm branches
    # are disabled in this configuration (noise_var=0, norm=None) and are not
    # implemented here.
    print("KERNEL_OK")
</pallas_src>

<mosaic_0001>
module attributes {stable_mosaic.version = 11 : i64} {
  func.func @_fused_kernel(%arg0: i32, %arg1: memref<36x512xf32, #tpu.memory_space<vmem>>, %arg2: memref<32x36xf32, #tpu.memory_space<vmem>>, %arg3: memref<32x32xf32, #tpu.memory_space<vmem>>, %arg4: memref<32x512xf32, #tpu.memory_space<vmem>>) attributes {dimension_semantics = [#tpu.dimension_semantics<arbitrary>], iteration_bounds = array<i64: 1>, scalar_prefetch = 0 : i64, scratch_operands = 0 : i64, tpu.core_type = #tpu.core_type<tc>, window_params = [{pipeline_mode = #tpu.pipeline_mode<synchronous>, transform_indices = @transform_0, window_bounds = array<i64: 36, 512>}, {pipeline_mode = #tpu.pipeline_mode<synchronous>, transform_indices = @transform_1, window_bounds = array<i64: 32, 36>}, {pipeline_mode = #tpu.pipeline_mode<synchronous>, transform_indices = @transform_2, window_bounds = array<i64: 32, 32>}, {pipeline_mode = #tpu.pipeline_mode<synchronous>, transform_indices = @transform_3, window_bounds = array<i64: 32, 512>}]} {
    %c0 = arith.constant 0 : index
    %c0_0 = arith.constant 0 : index
    %0 = vector.load %arg2[%c0, %c0_0] : memref<32x36xf32, #tpu.memory_space<vmem>>, vector<32x36xf32>
    %c0_1 = arith.constant 0 : index
    %c0_2 = arith.constant 0 : index
    %1 = vector.load %arg1[%c0_1, %c0_2] : memref<36x512xf32, #tpu.memory_space<vmem>>, vector<36x512xf32>
    %cst = arith.constant dense<0.000000e+00> : vector<32x512xf32>
    %2 = tpu.matmul %0, %1, %cst {dimension_numbers = #tpu.dot_dimension_numbers<[1], [0], [0], [1], [0, 0, 1, 1], [], []>} : vector<32x36xf32>, vector<36x512xf32>, vector<32x512xf32> -> vector<32x512xf32>
    %cst_3 = arith.constant 0.000000e+00 : f32
    %3 = vector.broadcast %cst_3 : f32 to vector<32x512xf32>
    %4 = arith.maximumf %2, %3 : vector<32x512xf32>
    %c0_4 = arith.constant 0 : index
    %c0_5 = arith.constant 0 : index
    %5 = vector.load %arg3[%c0_4, %c0_5] : memref<32x32xf32, #tpu.memory_space<vmem>>, vector<32x32xf32>
    %cst_6 = arith.constant dense<0.000000e+00> : vector<32x512xf32>
    %6 = tpu.matmul %5, %4, %cst_6 {dimension_numbers = #tpu.dot_dimension_numbers<[1], [0], [0], [1], [0, 0, 1, 1], [], []>} : vector<32x32xf32>, vector<32x512xf32>, vector<32x512xf32> -> vector<32x512xf32>
    %cst_7 = arith.constant 0.000000e+00 : f32
    %7 = vector.broadcast %cst_7 : f32 to vector<32x512xf32>
    %8 = arith.maximumf %6, %7 : vector<32x512xf32>
    %c0_8 = arith.constant 0 : index
    %c0_9 = arith.constant 0 : index
    %9 = vector.load %arg4[%c0_8, %c0_9] : memref<32x512xf32, #tpu.memory_space<vmem>>, vector<32x512xf32>
    tpu.vector_store %arg4[%c0_8, %c0_9], %8 {strides = array<i32>} : memref<32x512xf32, #tpu.memory_space<vmem>>, vector<32x512xf32>,
    return
  }
  func.func @transform_0(%arg0: i32) -> (i32, i32) {
    %c0_i32 = arith.constant 0 : i32
    %c0_i32_0 = arith.constant 0 : i32
    %c0_i32_1 = arith.constant 0 : i32
    return %c0_i32, %c0_i32_0 : i32, i32
  }
  func.func @transform_1(%arg0: i32) -> (i32, i32) {
    %c0_i32 = arith.constant 0 : i32
    %c0_i32_0 = arith.constant 0 : i32
    %c0_i32_1 = arith.constant 0 : i32
    return %c0_i32, %c0_i32_0 : i32, i32
  }
  func.func @transform_2(%arg0: i32) -> (i32, i32) {
    %c0_i32 = arith.constant 0 : i32
    %c0_i32_0 = arith.constant 0 : i32
    %c0_i32_1 = arith.constant 0 : i32
    return %c0_i32, %c0_i32_0 : i32, i32
  }
  func.func @transform_3(%arg0: i32) -> (i32, i32) {
    %c0_i32 = arith.constant 0 : i32
    %c0_i32_0 = arith.constant 0 : i32
    %c0_i32_1 = arith.constant 0 : i32
    return %c0_i32, %c0_i32_0 : i32, i32
  }
}

</mosaic_0001>

<bundles_post_ra>
// kernel: pr_conv_block.1
= control target key start
LH: loop header
LB: loop body
LE: loop exit
PB: predicated region body
PF: predicated region fallthrough
CT: control target
= control target key end

     0   :  { %v542_v3 = vmov 0.0   ;;  %vm51_vm0 = vcmask 1043456   ;;  %vm38_vm1 = vcmask 293888   ;;  %vm262_vm2 = vcmask 261120   ;;  %s727_s0 = inlined_call_operand.vmem [shape: f32[36,512], index: 0, kind: input, shape index: {}]   ;;  %s728_s1 = inlined_call_operand.vmem [shape: f32[32,36], index: 1, kind: input, shape index: {}]   ;;  %s729_s2 = inlined_call_operand.vmem [shape: f32[32,32], index: 2, kind: input, shape index: {}]   ;;  %s730_s3 = inlined_call_operand.vmem [shape: f32[32,512], index: 3, kind: output, shape index: {}]  }
   0x1   :  { %v19_v0 = vld [vmem:[%s727_s0 + $0x8] sm:$0xff]  ;;  %v21_v2 = vld [vmem:[%s727_s0 + $0x18] sm:$0xff]  ;;  %128 = vmatprep.mubr.f32.mxu0 %v542_v3  ;;  %217 = vmatprep.mubr.f32.mxu1 %v542_v3  ;;  %v18_v6 = vld [vmem:[%s727_s0] sm:$0xff] }
   0x2   :  { %v23_v1 = vld [vmem:[%s727_s0 + $0x28] sm:$0xff]  ;;  %v25_v5 = vld [vmem:[%s727_s0 + $0x38] sm:$0xff]  ;;  %v22_v7 = vld [vmem:[%s727_s0 + $0x20] sm:$0xff] }
   0x3   :  { %v509_v4 = vpack.c.bf16 %v23_v1, %v19_v0  ;;  %v517_v8 = vpack.c.bf16 %v25_v5, %v21_v2  ;;  %v511_v9 = vpack.c.bf16 %v22_v7, %v18_v6  ;;  %v20_v10 = vld [vmem:[%s727_s0 + $0x10] sm:$0xff]  ;;  %v27_v12 = vld [vmem:[%s727_s0 + $0x48] sm:$0xff]  ;;  %v29_v15 = vld [vmem:[%s727_s0 + $0x58] sm:$0xff] }
   0x4   :  { %v24_v11 = vld [vmem:[%s727_s0 + $0x30] sm:$0xff]  ;;  %v31_v14 = vld [vmem:[%s727_s0 + $0x68] sm:$0xff]  ;;  %v33_v16 = vld [vmem:[%s727_s0 + $0x78] sm:$0xff] }
   0x5   :  { %510 = vmatprep.subr.bf16.mxu0 %v509_v4  ;;  %v519_v13 = vpack.c.bf16 %v24_v11, %v20_v10  ;;  %518 = vmatprep.subr.bf16.mxu1 %v517_v8  ;;  %v513_v17 = vpack.c.bf16 %v31_v14, %v27_v12  ;;  %v521_v18 = vpack.c.bf16 %v33_v16, %v29_v15  ;;  %v26_v19 = vld [vmem:[%s727_s0 + $0x40] sm:$0xff]  ;;  %v28_v21 = vld [vmem:[%s727_s0 + $0x50] sm:$0xff]  ;;  %v35_v25 = vld [vmem:[%s727_s0 + $0x88] sm:$0xf] }
   0x6   :  { %512 = vmatpush1.bf16.msra.mxu0 %v511_v9  ;;  %v30_v20 = vld [vmem:[%s727_s0 + $0x60] sm:$0xff]  ;;  %v32_v23 = vld [vmem:[%s727_s0 + $0x70] sm:$0xff]  ;;  %v37_v26 = vld [vmem:[%s727_s0 + $0x98] sm:$0xf] }
   0x7   :  { %520 = vmatpush1.bf16.msra.mxu1 %v519_v13  ;;  %v515_v22 = vpack.c.bf16 %v30_v20, %v26_v19  ;;  %514 = vmatprep.subr.bf16.mxu0 %v513_v17  ;;  %v523_v24 = vpack.c.bf16 %v32_v23, %v28_v21  ;;  %v34_v27 = vld [vmem:[%s727_s0 + $0x80] sm:$0xf]  ;;  %v36_v28 = vld [vmem:[%s727_s0 + $0x90] sm:$0xf]  ;;  %v15_v30 = vld [vmem:[%s728_s1 + $0x8] sm:$0xff] }
   0x8   :  { %522 = vmatprep.subr.bf16.mxu1 %v521_v18  ;;  %v14_v29 = vld [vmem:[%s728_s1] sm:$0xff]  ;;  %v16_v31 = vld [vmem:[%s728_s1 + $0x10] sm:$0xff]  ;;  %v17_v32 = vld [vmem:[%s728_s1 + $0x18] sm:$0xff] }
   0x9   :  { %v258_v10 = vld [vmem:[%s729_s2] sm:$0xff]  ;;  %v259_v11 = vld [vmem:[%s729_s2 + $0x8] sm:$0xff]  ;;  %v260_v12 = vld [vmem:[%s729_s2 + $0x10] sm:$0xff] }
   0xa   :  { %516 = vmatpush1.bf16.msra.mxu0 %v515_v22  ;;  %v261_v13 = vld [vmem:[%s729_s2 + $0x18] sm:$0xff] }
   0xb   :  { %524 = vmatpush1.bf16.msra.mxu1 %v523_v24  ;;  %489 = vmatprep.subr.msk.mxu0 %vm51_vm0, %v35_v25 }
   0xc   :  { %495 = vmatprep.subr.msk.mxu1 %vm51_vm0, %v37_v26 }
   0xe   :  { %490 = vmatpush1.msk.msra.mxu0 %vm51_vm0, %v34_v27 }
   0xf   :  { %496 = vmatpush1.msk.msra.mxu1 %vm51_vm0, %v36_v28  ;;  %491 = vmatmul.mubr.msk.f32.vlgmr.msra.gmra.mrb[0].mxu0 %vm38_vm1, %v14_v29 }
  0x10   :  { %497 = vmatmul.mubr.msk.f32.vlgmr.msra.gmra.mrb[0].mxu1 %vm38_vm1, %v14_v29  ;;  %134 = vmatprep.mubr.f32.mxu0 %v542_v3 }
  0x11   :  { %223 = vmatprep.mubr.f32.mxu1 %v542_v3 }
  0x13   :  { %492 = vmatmul.mubr.msk.f32.gmra.mrb[2].mxu0 %vm38_vm1, %v15_v30 }
  0x14   :  { %498 = vmatmul.mubr.msk.f32.gmra.mrb[2].mxu1 %vm38_vm1, %v15_v30  ;;  %140 = vmatprep.mubr.f32.mxu0 %v542_v3 }
  0x15   :  { %229 = vmatprep.mubr.f32.mxu1 %v542_v3 }
  0x17   :  { %493 = vmatmul.mubr.msk.f32.gmra.mrb[4].mxu0 %vm38_vm1, %v16_v31 }
  0x18   :  { %499 = vmatmul.mubr.msk.f32.gmra.mrb[4].mxu1 %vm38_vm1, %v16_v31  ;;  %146 = vmatprep.mubr.f32.mxu0 %v542_v3 }
  0x19   :  { %235 = vmatprep.mubr.f32.mxu1 %v542_v3 }
  0x1b   :  { %494 = vmatmul.mubr.msk.f32.gmra.mrb[6].mxu0 %vm38_vm1, %v17_v32 }
  0x1c   :  { %500 = vmatmul.mubr.msk.f32.gmra.mrb[6].mxu1 %vm38_vm1, %v17_v32  ;;  %339 = vmatprep.mubr.f32.mxu0 %v542_v3 }
  0x1d   :  { %428 = vmatprep.mubr.f32.mxu1 %v542_v3 }
  0xe2   :  { %v130_v33 = vpop.f32.mrb[0].mxu0 }
  0xe3   :  { %v219_v34 = vpop.f32.mrb[0].mxu1  ;;  %v132_v35 = vpop.f32.mrb[1].mxu0  ;;  %v242_v38 = vmax.f32 %v130_v33, 0.0 }
  0xe4   :  { %v221_v36 = vpop.f32.mrb[1].mxu1  ;;  %v244_v42 = vmax.f32 %v219_v34, 0.0  ;;  %v243_v43 = vmax.f32 %v132_v35, 0.0 }
  0xe5   :  { %v245_v47 = vmax.f32 %v221_v36, 0.0 }
  0xe6   :  { %v136_v37 = vpop.f32.mrb[2].mxu0 }
  0xe7   :  { %v246_v39 = vmax.f32 %v136_v37, 0.0  ;;  %v225_v40 = vpop.f32.mrb[2].mxu1  ;;  %v138_v41 = vpop.f32.mrb[3].mxu0 }
  0xe8   :  { %v248_v44 = vmax.f32 %v225_v40, 0.0  ;;  %v247_v45 = vmax.f32 %v138_v41, 0.0  ;;  %v227_v46 = vpop.f32.mrb[3].mxu1 }
  0xe9   :  { %v527_v48 = vpack.c.bf16 %v246_v39, %v242_v38  ;;  %v249_v49 = vmax.f32 %v227_v46, 0.0 }
  0xea   :  { %v535_v50 = vpack.c.bf16 %v248_v44, %v244_v42  ;;  %v525_v51 = vpack.c.bf16 %v247_v45, %v243_v43  ;;  %v142_v52 = vpop.f32.mrb[4].mxu0 }
  0xeb   :  { %v533_v53 = vpack.c.bf16 %v249_v49, %v245_v47  ;;  %v231_v54 = vpop.f32.mrb[4].mxu1  ;;  %v144_v55 = vpop.f32.mrb[5].mxu0  ;;  %v250_v58 = vmax.f32 %v142_v52, 0.0 }
  0xec   :  { %v233_v56 = vpop.f32.mrb[5].mxu1  ;;  %526 = vmatprep.subr.bf16.mxu0 %v525_v51  ;;  %v252_v62 = vmax.f32 %v231_v54, 0.0  ;;  %v251_v63 = vmax.f32 %v144_v55, 0.0 }
  0xed   :  { %534 = vmatprep.subr.bf16.mxu1 %v533_v53  ;;  %528 = vmatpush1.bf16.msra.mxu0 %v527_v48  ;;  %v253_v4 = vmax.f32 %v233_v56, 0.0 }
  0xee   :  { %536 = vmatpush1.bf16.msra.mxu1 %v535_v50  ;;  %v148_v57 = vpop.f32.mrb[6].mxu0 }
  0xef   :  { %v254_v59 = vmax.f32 %v148_v57, 0.0  ;;  %v237_v60 = vpop.f32.mrb[6].mxu1  ;;  %v150_v61 = vpop.f32.mrb[7].mxu0 }
  0xf0   :  { %v256_v0 = vmax.f32 %v237_v60, 0.0  ;;  %v255_v1 = vmax.f32 %v150_v61, 0.0  ;;  %v239_v2 = vpop.f32.mrb[7].mxu1 }
  0xf1   :  { %v531_v5 = vpack.c.bf16 %v254_v59, %v250_v58  ;;  %v257_v6 = vmax.f32 %v239_v2, 0.0 }
  0xf2   :  { %v539_v7 = vpack.c.bf16 %v256_v0, %v252_v62  ;;  %v529_v8 = vpack.c.bf16 %v255_v1, %v251_v63 }
  0xf3   :  { %v537_v9 = vpack.c.bf16 %v257_v6, %v253_v4 }
  0xf4   :  { %530 = vmatprep.subr.bf16.mxu0 %v529_v8 }
  0xf5   :  { %538 = vmatprep.subr.bf16.mxu1 %v537_v9  ;;  %532 = vmatpush1.bf16.msra.mxu0 %v531_v5 }
  0xf6   :  { %540 = vmatpush1.bf16.msra.mxu1 %v539_v7 }
  0xf8   :  { %501 = vmatmul.mubr.msk.f32.vlgmr.msra.gmra.mrb[8].mxu0 %vm262_vm2, %v258_v10 }
  0xf9   :  { %505 = vmatmul.mubr.msk.f32.vlgmr.msra.gmra.mrb[8].mxu1 %vm262_vm2, %v258_v10  ;;  %345 = vmatprep.mubr.f32.mxu0 %v542_v3 }
  0xfa   :  { %434 = vmatprep.mubr.f32.mxu1 %v542_v3 }
  0xfc   :  { %502 = vmatmul.mubr.msk.f32.gmra.mrb[10].mxu0 %vm262_vm2, %v259_v11 }
  0xfd   :  { %506 = vmatmul.mubr.msk.f32.gmra.mrb[10].mxu1 %vm262_vm2, %v259_v11  ;;  %351 = vmatprep.mubr.f32.mxu0 %v542_v3 }
  0xfe   :  { %440 = vmatprep.mubr.f32.mxu1 %v542_v3 }
 0x100   :  { %503 = vmatmul.mubr.msk.f32.gmra.mrb[12].mxu0 %vm262_vm2, %v260_v12 }
 0x101   :  { %507 = vmatmul.mubr.msk.f32.gmra.mrb[12].mxu1 %vm262_vm2, %v260_v12  ;;  %357 = vmatprep.mubr.f32.mxu0 %v542_v3 }
 0x102   :  { %446 = vmatprep.mubr.f32.mxu1 %v542_v3 }
 0x104   :  { %504 = vmatmul.mubr.msk.f32.gmra.mrb[14].mxu0 %vm262_vm2, %v261_v13 }
 0x105   :  { %508 = vmatmul.mubr.msk.f32.gmra.mrb[14].mxu1 %vm262_vm2, %v261_v13 }
 0x1cb   :  { %v341_v14 = vpop.f32.mrb[8].mxu0 }
 0x1cc   :  { %v453_v15 = vmax.f32 %v341_v14, 0.0  ;;  %v430_v16 = vpop.f32.mrb[8].mxu1  ;;  %v343_v17 = vpop.f32.mrb[9].mxu0 }
 0x1cd   :  { %v455_v18 = vmax.f32 %v430_v16, 0.0  ;;  %v454_v19 = vmax.f32 %v343_v17, 0.0  ;;  %v432_v20 = vpop.f32.mrb[9].mxu1 }
 0x1ce   :  { %469 = vst [vmem:[%s730_s3] sm:$0xff] %v453_v15  ;;  %v456_v21 = vmax.f32 %v432_v20, 0.0 }
 0x1cf   :  { %471 = vst [vmem:[%s730_s3 + $0x10] sm:$0xff] %v455_v18  ;;  %470 = vst [vmem:[%s730_s3 + $0x8] sm:$0xff] %v454_v19  ;;  %v347_v3 = vpop.f32.mrb[10].mxu0 }
 0x1d0   :  { %472 = vst [vmem:[%s730_s3 + $0x18] sm:$0xff] %v456_v21  ;;  %v457_v22 = vmax.f32 %v347_v3, 0.0  ;;  %v436_v23 = vpop.f32.mrb[10].mxu1  ;;  %v349_v24 = vpop.f32.mrb[11].mxu0 }
 0x1d1   :  { %v459_v25 = vmax.f32 %v436_v23, 0.0  ;;  %v458_v26 = vmax.f32 %v349_v24, 0.0  ;;  %v438_v27 = vpop.f32.mrb[11].mxu1 }
 0x1d2   :  { %473 = vst [vmem:[%s730_s3 + $0x20] sm:$0xff] %v457_v22  ;;  %v460_v28 = vmax.f32 %v438_v27, 0.0 }
 0x1d3   :  { %475 = vst [vmem:[%s730_s3 + $0x30] sm:$0xff] %v459_v25  ;;  %474 = vst [vmem:[%s730_s3 + $0x28] sm:$0xff] %v458_v26  ;;  %v353_v29 = vpop.f32.mrb[12].mxu0 }
 0x1d4   :  { %476 = vst [vmem:[%s730_s3 + $0x38] sm:$0xff] %v460_v28  ;;  %v461_v30 = vmax.f32 %v353_v29, 0.0  ;;  %v442_v31 = vpop.f32.mrb[12].mxu1  ;;  %v355_v32 = vpop.f32.mrb[13].mxu0 }
 0x1d5   :  { %v463_v33 = vmax.f32 %v442_v31, 0.0  ;;  %v462_v34 = vmax.f32 %v355_v32, 0.0  ;;  %v444_v35 = vpop.f32.mrb[13].mxu1 }
 0x1d6   :  { %477 = vst [vmem:[%s730_s3 + $0x40] sm:$0xff] %v461_v30  ;;  %v464_v36 = vmax.f32 %v444_v35, 0.0 }
 0x1d7   :  { %479 = vst [vmem:[%s730_s3 + $0x50] sm:$0xff] %v463_v33  ;;  %478 = vst [vmem:[%s730_s3 + $0x48] sm:$0xff] %v462_v34  ;;  %v359_v37 = vpop.f32.mrb[14].mxu0 }
 0x1d8   :  { %480 = vst [vmem:[%s730_s3 + $0x58] sm:$0xff] %v464_v36  ;;  %v465_v38 = vmax.f32 %v359_v37, 0.0  ;;  %v448_v39 = vpop.f32.mrb[14].mxu1  ;;  %v361_v40 = vpop.f32.mrb[15].mxu0 }
 0x1d9   :  { %v467_v41 = vmax.f32 %v448_v39, 0.0  ;;  %v466_v42 = vmax.f32 %v361_v40, 0.0  ;;  %v450_v43 = vpop.f32.mrb[15].mxu1 }
 0x1da   :  { %481 = vst [vmem:[%s730_s3 + $0x60] sm:$0xff] %v465_v38  ;;  %v468_v44 = vmax.f32 %v450_v43, 0.0 }
 0x1db   :  { %483 = vst [vmem:[%s730_s3 + $0x70] sm:$0xff] %v467_v41  ;;  %482 = vst [vmem:[%s730_s3 + $0x68] sm:$0xff] %v466_v42 }
 0x1dc   :  { %484 = vst [vmem:[%s730_s3 + $0x78] sm:$0xff] %v468_v44 }

</bundles_post_ra>
